<compile_context>
chip_gen: v6e
topology: v6e:2x2x1
jax: 0.10.0
libtpu: 0.0.40
codegen_flags: <defaults>
</compile_context>

<pallas_src>
import math

import jax
import jax.numpy as jnp
import numpy as np
from jax import lax
from jax.experimental import pallas as pl
from jax.experimental.pallas import tpu as pltpu

_LANES = 128
_TARGET_BLOCK_BYTES = 8 << 20      # ~8 MiB of output per grid step (per review)
_MAX_PAD_FRACTION = 0.25           # lazy-broadcast fallback beyond this padding
_STATIC_UNROLL_MAX = 4             # python-unroll the in-kernel rep loop up to this


def _lcm(a, b):
    return a * b // math.gcd(a, b)


def _round_up(x, m):
    return ((x + m - 1) // m) * m


def _cdiv(a, b):
    return -(-a // b)


# ---------------------------------------------------------------------------
# Pallas kernel: replicate one lane-dense pattern period across the current
# output block with full-width stores.
#   pat_ref: (period_rows, 128)        -- one lcm period of the pattern
#   out_ref: (reps, period_rows, 128)  -- current output block
# ---------------------------------------------------------------------------
def _replicate_kernel(pat_ref, out_ref):
    pat = pat_ref[...]                     # loaded once per grid step
    reps = out_ref.shape[0]                # static at trace time
    if reps <= _STATIC_UNROLL_MAX:
        for r in range(reps):
            out_ref[r] = pat
    else:
        def body(r, carry):
            out_ref[r] = pat
            return carry
        lax.fori_loop(0, reps, body, 0)


def _table_geometry(table):
    """Lane-dense tiling geometry for one (P, C) table."""
    P, C = int(table.shape[0]), int(table.shape[1])
    pc = P * C
    itemsize = table.dtype.itemsize
    sublanes = max(8, 32 // itemsize)             # 8 for f32, 16 for bf16, ...
    unit_rows = _lcm(pc, _LANES) // _LANES        # pattern period in 128-lane rows
    period_rows = _lcm(unit_rows, sublanes)       # + sublane alignment
    slab_unit = period_rows * _LANES // pc        # batch elements per period
    return pc, period_rows, slab_unit


def _broadcast_one_table(table, batch_size, *, target_block_bytes, force_pallas):
    """Return (batch_size, P, C) = `table` replicated over the batch axis."""
    table = jnp.asarray(table)
    P, C = int(table.shape[0]), int(table.shape[1])
    pc, period_rows, slab_unit = _table_geometry(table)
    itemsize = table.dtype.itemsize

    # Small-batch / high-padding guard (per review): a lazy XLA broadcast is
    # strictly faster than a kernel launch plus padded HBM writes.
    slabs_needed = _round_up(batch_size, slab_unit)
    pad_frac = (slabs_needed - batch_size) / max(batch_size, 1)
    if not force_pallas and (batch_size < slab_unit or pad_frac > _MAX_PAD_FRACTION):
        return jnp.broadcast_to(table[None, :, :], (batch_size, P, C))

    # --- Block sizing -------------------------------------------------------
    bytes_per_slab = pc * itemsize
    target_slabs = max(1, target_block_bytes // bytes_per_slab)
    slabs_per_block = max(slab_unit, (target_slabs // slab_unit) * slab_unit)
    slabs_per_block = min(slabs_per_block, slabs_needed)
    # Keep >= 2 blocks when possible so v7x's two TensorCores both stream.
    half = (slabs_needed // 2 // slab_unit) * slab_unit
    if half >= slab_unit:
        slabs_per_block = min(slabs_per_block, half)
    # Tighten padding: spread slabs over the block count instead of rounding
    # the tail up to a full block.
    n_blocks = _cdiv(slabs_needed, slabs_per_block)
    slabs_per_block = _round_up(_cdiv(slabs_needed, n_blocks), slab_unit)
    padded_batch = n_blocks * slabs_per_block

    reps_per_block = slabs_per_block // slab_unit
    total_periods = padded_batch // slab_unit

    # One lcm period of the repeated pattern (tiny; replicated in-kernel).
    pattern = jnp.tile(table.reshape(-1), slab_unit).reshape(period_rows, _LANES)

    # Explicit VMEM budget: double-buffered output block + tiny pattern input.
    block_bytes = slabs_per_block * bytes_per_slab
    pattern_bytes = period_rows * _LANES * itemsize
    vmem_limit = 2 * block_bytes + 2 * pattern_bytes + (4 << 20)
    vmem_limit = int(min(max(vmem_limit, 16 << 20), 48 << 20))   # v7x-safe cap

    flat = pl.pallas_call(
        _replicate_kernel,
        out_shape=jax.ShapeDtypeStruct(
            (total_periods, period_rows, _LANES), table.dtype),
        grid=(n_blocks,),
        in_specs=[pl.BlockSpec((period_rows, _LANES), lambda i: (0, 0))],
        out_specs=pl.BlockSpec(
            (reps_per_block, period_rows, _LANES), lambda i: (i, 0, 0)),
        compiler_params=pltpu.CompilerParams(
            dimension_semantics=("parallel",),
            vmem_limit_bytes=vmem_limit),
    )(pattern)

    out = flat.reshape(padded_batch, P, C)
    if padded_batch != batch_size:
        # TODO(synk): if the consumer can accept the padded slab, drop this
        # slice to avoid re-reading/re-writing the useful output.
        out = out[:batch_size]
    return out


def broadcast_tables_to_batch(tables, batch_size,
                              target_block_bytes=_TARGET_BLOCK_BYTES,
                              force_pallas=False):
    """For each 2D table (P_i, C_i) return (batch_size, P_i, C_i), replicated
    over the batch axis with a lane-dense Pallas copy kernel (per-table calls,
    each with its own minimal slab granularity)."""
    return [
        _broadcast_one_table(jnp.asarray(t), batch_size,
                             target_block_bytes=target_block_bytes,
                             force_pallas=force_pallas)
        for t in tables
    ]


# ---------------------------------------------------------------------------
# Model wrapper (mirrors ClimatologicalModel.forward semantics)
# ---------------------------------------------------------------------------
class ClimatologicalModelPallas:
    def __init__(self, rgt, rgt_binary, log_samples):
        # rgt:        (1, n_pred + 1, n_bins + 1)  climatological stats
        # rgt_binary: (1, n_binary_pred, 3)
        self.rgt = jnp.asarray(rgt)
        self.rgt_binary = jnp.asarray(rgt_binary)
        self.log_samples = log_samples

    def forward(self, input0, mode, n_bins=None, y=None, n_steps=None,
                predictions=None, binary_predictions=None, binning=False,
                target_block_bytes=_TARGET_BLOCK_BYTES):
        length = len(self.log_samples)
        batch_size = input0.shape[1]
        if binning:
            n_pred = len(predictions['eval'])
            n_bpred = len(binary_predictions['eval'])
            # Per-batch tables formed exactly as in the reference:
            #   rgt[:, :-1]       -> (1, n_pred, n_bins + 1)
            #   rgt_binary[:, :3] -> (1, n_bpred, 3)
            table_a = jnp.broadcast_to(
                self.rgt[:, :-1], (1, n_pred, n_bins + 1))[0]
            table_b = jnp.broadcast_to(
                self.rgt_binary[:, :3], (1, n_bpred, 3))[0]
            a, b = broadcast_tables_to_batch(
                [table_a, table_b], batch_size,
                target_block_bytes=target_block_bytes)
            return ([a] * length, [b] * length)
        # TODO(synk): reference np.broadcast_to(rgt[:, :-1], (batch, rgt.shape[2]))
        # is dimensionally ill-posed (3D -> 2D); we use the first predictor row
        # rgt[0, 0, :] to honor the (batch, rgt.shape[2]) output contract.
        row = self.rgt[0, 0, :].reshape(1, -1)           # (1, n_bins + 1)
        (a3,) = broadcast_tables_to_batch(
            [row], batch_size, target_block_bytes=target_block_bytes)
        return [a3[:, 0, :]] * length                    # (batch, rgt.shape[2])


# ---------------------------------------------------------------------------
# Demo / self-test
# ---------------------------------------------------------------------------
if __name__ == "__main__":
    key = jax.random.PRNGKey(0)
    k1, k2, k3 = jax.random.split(key, 3)

    # Small, deterministic synthetic setup.
    seq_len, batch_size, n_features = 8, 2, 4
    n_pred = 4          # len(predictions['eval'])
    n_binary_pred = 3   # len(binary_predictions['eval'])
    n_bins = 8
    log_samples = [10, 100]

    # input0: (seq, batch, features) -- only the batch dim (axis 1) is used.
    input0 = jax.random.normal(k1, (seq_len, batch_size, n_features),
                               dtype=jnp.float32)
    rgt = jax.random.uniform(k2, (1, n_pred + 1, n_bins + 1), dtype=jnp.float32)
    rgt_binary = jax.random.uniform(k3, (1, n_binary_pred, 3), dtype=jnp.float32)

    predictions = {"eval": [None] * n_pred}
    binary_predictions = {"eval": [None] * n_binary_pred}

    model = ClimatologicalModelPallas(rgt, rgt_binary, log_samples)
    rgt_np = np.asarray(rgt)
    rgt_bin_np = np.asarray(rgt_binary)

    # --- 1) Tiny batch: small-batch guard -> lazy broadcast fast path. -------
    a_list, b_list = model.forward(
        input0, mode="eval", n_bins=n_bins,
        predictions=predictions, binary_predictions=binary_predictions,
        binning=True)
    a = jax.block_until_ready(a_list[0])
    b = jax.block_until_ready(b_list[0])
    c_list = model.forward(input0, mode="eval", binning=False)
    c = jax.block_until_ready(c_list[0])

    np.testing.assert_array_equal(
        np.asarray(a),
        np.broadcast_to(rgt_np[:, :-1], (batch_size, n_pred, n_bins + 1)))
    np.testing.assert_array_equal(
        np.asarray(b),
        np.broadcast_to(rgt_bin_np[:, :3], (batch_size, n_binary_pred, 3)))
    np.testing.assert_array_equal(
        np.asarray(c),
        np.broadcast_to(rgt_np[0, 0, :], (batch_size, n_bins + 1)))
    assert a.shape == (batch_size, n_pred, n_bins + 1)
    assert b.shape == (batch_size, n_binary_pred, 3)
    assert c.shape == (batch_size, n_bins + 1)
    assert len(a_list) == len(log_samples) and len(b_list) == len(log_samples)

    # --- 2) Larger batch through forward(): Pallas path for both tables
    #        (in-kernel replication loop, multi-block grid, padded slice). ----
    big_batch = 2560
    big_input = jnp.zeros((seq_len, big_batch, n_features), dtype=jnp.float32)
    a_list2, b_list2 = model.forward(
        big_input, mode="eval", n_bins=n_bins,
        predictions=predictions, binary_predictions=binary_predictions,
        binning=True)
    a2 = jax.block_until_ready(a_list2[0])
    b2 = jax.block_until_ready(b_list2[0])
    np.testing.assert_array_equal(
        np.asarray(a2),
        np.broadcast_to(rgt_np[:, :-1], (big_batch, n_pred, n_bins + 1)))
    np.testing.assert_array_equal(
        np.asarray(b2),
        np.broadcast_to(rgt_bin_np[:, :3], (big_batch, n_binary_pred, 3)))

    # --- 3) Direct kernel test with a tiny block budget: forces a 10-block
    #        grid plus the tightened-padding / slice-back path. ---------------
    odd_batch = 2500
    (big_a,) = broadcast_tables_to_batch(
        [rgt_np[0, :-1, :]], odd_batch,
        target_block_bytes=64 * 1024, force_pallas=True)
    big_a = jax.block_until_ready(big_a)
    np.testing.assert_array_equal(
        np.asarray(big_a),
        np.broadcast_to(rgt_np[0, :-1, :], (odd_batch, n_pred, n_bins + 1)))

    print("KERNEL_OK")
</pallas_src>

<mosaic_0001>
module attributes {stable_mosaic.version = 11 : i64} {
  func.func @_replicate_kernel(%arg0: i32, %arg1: memref<72x128xf32, #tpu.memory_space<vmem>>, %arg2: memref<5x72x128xf32, #tpu.memory_space<vmem>>) attributes {dimension_semantics = [#tpu.dimension_semantics<parallel>], iteration_bounds = array<i64: 2>, scalar_prefetch = 0 : i64, scratch_operands = 0 : i64, tpu.core_type = #tpu.core_type<tc>, window_params = [{pipeline_mode = #tpu.pipeline_mode<synchronous>, transform_indices = @transform_0, window_bounds = array<i64: 72, 128>}, {transform_indices = @transform_1, window_bounds = array<i64: 5, 72, 128>}]} {
    %c0 = arith.constant 0 : index
    %c0_0 = arith.constant 0 : index
    %0 = vector.load %arg1[%c0, %c0_0] : memref<72x128xf32, #tpu.memory_space<vmem>>, vector<72x128xf32>
    %c0_i32 = arith.constant 0 : i32
    %c5_i32 = arith.constant 5 : i32
    %1 = arith.addi %c0_i32, %c5_i32 : i32
    %c1_i32 = arith.constant 1 : i32
    scf.for %arg3 = %c0_i32 to %1 step %c1_i32  : i32 {
      %2 = arith.index_cast %arg3 : i32 to index
      %c0_2 = arith.constant 0 : index
      %c0_3 = arith.constant 0 : index
      %3 = vector.load %arg2[%2, %c0_2, %c0_3] : memref<5x72x128xf32, #tpu.memory_space<vmem>>, vector<1x72x128xf32>
      %4 = vector.shape_cast %3 : vector<1x72x128xf32> to vector<72x128xf32>
      %5 = vector.shape_cast %0 : vector<72x128xf32> to vector<1x72x128xf32>
      tpu.vector_store %arg2[%2, %c0_2, %c0_3], %5 {strides = array<i32>} : memref<5x72x128xf32, #tpu.memory_space<vmem>>, vector<1x72x128xf32>,
    }
    %c5_i32_1 = arith.constant 5 : i32
    return
  }
  func.func @transform_0(%arg0: i32) -> (i32, i32) {
    %c0_i32 = arith.constant 0 : i32
    %c0_i32_0 = arith.constant 0 : i32
    %c0_i32_1 = arith.constant 0 : i32
    return %c0_i32, %c0_i32_0 : i32, i32
  }
  func.func @transform_1(%arg0: i32) -> (i32, i32, i32) {
    %c0_i32 = arith.constant 0 : i32
    %c0_i32_0 = arith.constant 0 : i32
    %c0_i32_1 = arith.constant 0 : i32
    return %arg0, %c0_i32, %c0_i32_0 : i32, i32, i32
  }
}

</mosaic_0001>

<bundles_post_ra>
// kernel: tpu_custom_call.1
= control target key start
LH: loop header
LB: loop body
LE: loop exit
PB: predicated region body
PF: predicated region fallthrough
CT: control target
= control target key end

     0   :  { %6 = vsyncpa [#allocation3], 0  ;;  %s532_s0 = inlined_call_operand.hbm [shape: f32[72,128], index: 0, kind: input, shape index: {}]   ;;  %s533_s1 = inlined_call_operand.hbm [shape: f32[10,72,128], index: 1, kind: output, shape index: {}]  }
   0x1   :  { %7 = vsyncpa [#allocation4], 0 }
   0x2   :  { %9 = vsyncpa [#allocation4 + $0x1], 0  ;;  %s410_s6 = smov 0   ;;  %s412_s7 = smov 0  }
   0x3   :  { %s414_s8 = smov 0   ;;  %s416_s9 = smov 0  }
   0x4 LB: > { %s431_s10 = sadd.s32 4294967295, %s388_s9   ;;  %s221_s11 = sadd.s32 4294967294, %s388_s9   ;;  %s388_s9 = sphi %s416_s9, %s541_s9   ;;  %s384_s8 = sphi %s414_s8, %s540_s8   ;;  %s380_s7 = sphi %s412_s7, %s539_s7   ;;  %s376_s6 = sphi %s410_s6, %s538_s6  }
   0x5   : > { %s435_s12 = sadd.s32 1, %s388_s9   ;;  %s43_s13 = sadd.s32 1, %s384_s8 }
   0x6   : > { %s40_s14 = ssub.s32 %s388_s9, %s435_s12  ;;  %p53_p0 = scmp.ne.s32.totalorder %s384_s8, %s380_s7 }
   0x7   : > { %p41_p1 = scmp.eq.s32.totalorder %s40_s14, 0  ;;  %p54_p2 = scmp.eq.s32.totalorder %s431_s10, 1 }
   0x8   : > { %p59_p3 = scmp.ne.s32.totalorder %s380_s7, %s376_s6  ;;  %p60_p4 = scmp.eq.s32.totalorder %s221_s11, 1 }
   0x9   : > { %s446_s15 = scalar_select %p41_p1, %s384_s8, %s43_s13  }
   0xa   : > { %p448_p5 = por %p54_p2, %p53_p0  ;;  %p452_p6 = por %p60_p4, %p59_p3 }
   0xb   : > { %p222_p7 = scmp.ge.s32.totalorder %s388_s9, 1  ;;  %p67_p8 = scmp.lt.s32.totalorder %s388_s9, 3 }
   0xc   : > { %s535_s17 = scalar_select %p452_p6, 1, 0 }
   0xd   : > { %p245_p9 = scmp.eq.s32.totalorder %s431_s10, 0  ;;  %p459_p10 = pnand %p222_p7, %p67_p8 }
   0xe   : > { %s394_s19 = smov [#allocation2]  }
   0xf   : > { %s79_s20 = sshll.u32 %s394_s19, 4  ;;  %p237_p11 = pneg %p459_p10  ;;  %s80_s20 = int_to_ptr.vmem [resolvable:$true] %s79_s20 }
  0x10   : > { %s305_s21 = scalar_lea.vmem %s80_s20, 1152  ;;  %p313_p3 = scmp.lt.s32.totalorder %s80_s20, %s80_s20 }
  0x11   : > { %p238_p12 = pnand %p245_p9, %p237_p11  ;;  %p306_p0 = scmp.ne.s32.totalorder %s80_s20, %s305_s21 }
  0x12   : > { %p314_p4 = scmp.lt.s32.totalorder %s305_s21, %s305_s21 }
  0x13   : > { %p296_p13 = pneg %p238_p12 }
  0x14   : > { %p315_p6 = por %p314_p4, %p313_p3 }
  0x15   : > { %p308_p1 = pnand %p306_p0, %p296_p13 }
  0x17   : > { %p309_p2 = pneg %p308_p1 }
  0x19   : > { %p316_p7 = pnand %p315_p6, %p309_p2 }
  0x1b   : > { %319 = shalt.err (!%p316_p7)
}
  0x1c   : > { %s395_s22 = smov 128   ;;  %s396_s23 = smov 8  }
  0x1d   : > { %240 = dma.hbm_to_vmem [thread:$0]  (!%p238_p12), %s532_s0, 1152, %s80_s20, [#allocation3], %s395_s22, %s395_s22, %s396_s23  }
  0x1e   : > { %95 = sbr.rel (%p459_p10) target bundleno = 67 (0x43), region = 24 }
  0x23   : > { %367 = dma.done.wait (%p245_p9), [#allocation3], 1152  }
  0x24   : > { %369 = vsyncadd (%p245_p9), [#allocation3], 4294966144  ;;  %s107_s26 = sand.u32 1, %s380_s7   ;;  %v111_v0 = vld [vmem:[#allocation2] sm:$0xff]  ;;  %v112_v1 = vld [vmem:[#allocation2 + $0x8] sm:$0xff]  ;;  %s390_s29 = smov 0  }
  0x25   : > { %s479_s27 = smul.u32 360, %s107_s26  ;;  %v113_v2 = vld [vmem:[#allocation2 + $0x10] sm:$0xff]  ;;  %v114_v3 = vld [vmem:[#allocation2 + $0x18] sm:$0xff]  ;;  %v115_v4 = vld [vmem:[#allocation2 + $0x20] sm:$0xff] }
  0x26   : > { %v116_v5 = vld [vmem:[#allocation2 + $0x28] sm:$0xff]  ;;  %v117_v6 = vld [vmem:[#allocation2 + $0x30] sm:$0xff]  ;;  %v118_v7 = vld [vmem:[#allocation2 + $0x38] sm:$0xff] }
  0x27   : > { %v119_v8 = vld [vmem:[#allocation2 + $0x40] sm:$0xff]  ;;  %s109_s28 = scalar_lea.vmem [#allocation5], %s479_s27 }
  0x28 LB: >> { %s126_s30 = smul.u32 72, %s392_s29  ;;  %s125_s29 = sadd.s32 1, %s392_s29   ;;  %s392_s29 = sphi %s390_s29, %s125_s29  }
  0x29   : >> { %p122_p6 = scmp.ge.s32.totalorder %s125_s29, 5  }
  0x2a   : >> { %s127_s2 = scalar_lea.vmem %s109_s28, %s126_s30 [#allocation5]  ;;  %s247_s3 = smul.u32 (%p122_p6), 5760, %s431_s10 }
  0x2b   : >> { %128 = vst [vmem:[%s127_s2] sm:$0xff] %v111_v0  ;;  %129 = vst [vmem:[%s127_s2 + $0x8] sm:$0xff] %v112_v1  ;;  %124 = sbr.rel (!%p122_p6) target bundleno = 40 (0x28), region = 69  ;;  %s152_s4 = sshll.u32 (%p122_p6), %s109_s28, 4  ;;  %s483_s4 = int_to_ptr.vmem [resolvable:$true] %s152_s4 }
  0x2c   : >> { %130 = vst [vmem:[%s127_s2 + $0x10] sm:$0xff] %v113_v2  ;;  %131 = vst [vmem:[%s127_s2 + $0x18] sm:$0xff] %v114_v3  ;;  %s488_s13 = scalar_lea.hbm (%p122_p6), %s533_s1, %s247_s3  ;;  %s492_s14 = scalar_lea.sflag (%p122_p6), [#allocation4], %s107_s26 }
  0x2d   : >> { %132 = vst [vmem:[%s127_s2 + $0x20] sm:$0xff] %v115_v4  ;;  %133 = vst [vmem:[%s127_s2 + $0x28] sm:$0xff] %v116_v5  ;;  %s320_s18 = scalar_lea.vmem (%p122_p6), %s483_s4, 5760  ;;  %s397_s10 = smov (%p122_p6), [#allocation5]  }
  0x2e   : >> { %134 = vst [vmem:[%s127_s2 + $0x30] sm:$0xff] %v117_v6  ;;  %135 = vst [vmem:[%s127_s2 + $0x38] sm:$0xff] %v118_v7  ;;  %p321_p8 = scmp.ne.s32.totalorder (%p122_p6), %s483_s4, %s320_s18  ;;  %s324_s19 = sshll.u32 (%p122_p6), %s397_s10, 4  ;;  %s325_s19 = int_to_ptr.vmem [resolvable:$false] %s324_s19 }
  0x2f   : >> { %136 = vst [vmem:[%s127_s2 + $0x40] sm:$0xff] %v119_v8  ;;  %s326_s20 = scalar_lea.vmem (%p122_p6), %s325_s19, 11520  ;;  %p327_p11 = scmp.lt.s32.totalorder (%p122_p6), %s483_s4, %s325_s19 }
  0x30   : > { %p322_p9 = pnand %p321_p8, %p448_p5  ;;  %p328_p12 = scmp.lt.s32.totalorder %s326_s20, %s320_s18 }
  0x32   : > { %p323_p10 = pneg %p322_p9  ;;  %p329_p13 = por %p328_p12, %p327_p11 }
  0x34   : > { %p330_p0 = pnand %p329_p13, %p323_p10 }
  0x36   : > { %333 = shalt.err (!%p330_p0)
}
  0x37   : > { %s334_s21 = scalar_lea.hbm %s488_s13, 5760  ;;  %s338_s24 = scalar_lea.hbm %s533_s1, 11520 }
  0x38   : > { %p335_p1 = scmp.ne.s32.totalorder %s488_s13, %s334_s21  ;;  %p339_p4 = scmp.lt.s32.totalorder %s488_s13, %s533_s1 }
  0x39   : > { %p340_p7 = scmp.lt.s32.totalorder %s338_s24, %s334_s21 }
  0x3a   : > { %p336_p2 = pnand %p335_p1, %p448_p5 }
  0x3b   : > { %p341_p6 = por %p340_p7, %p339_p4 }
  0x3c   : > { %p337_p3 = pneg %p336_p2 }
  0x3e   : > { %p342_p8 = pnand %p341_p6, %p337_p3 }
  0x40   : > { %345 = shalt.err (!%p342_p8)
}
  0x41   : > { %s398_s27 = smov 128   ;;  %s399_s28 = smov 8  }
  0x42   : > { %235 = dma.vmem_to_hbm [thread:$0]  (%p448_p5), %s483_s4, 5760, %s488_s13, %s492_s14, %s398_s27, %s398_s27, %s399_s28  }
  0x43 PF: > { %p248_p9 = scmp.ge.s32.totalorder %s388_s9, 2  ;;  %s167_s29 = sand.u32 1, %s376_s6  }
  0x44   : > { %p537_p10 = scmp.ne.s32.totalorder %s535_s17, 0  ;;  %s168_s30 = scalar_lea.sflag [#allocation4], %s167_s29 }
  0x46   : > { %p242_p11 = pnand %p248_p9, %p537_p10 }
  0x48   : > { %p243_p12 = pneg %p242_p11 }
  0x4a   : > { %371 = dma.done.wait (%p243_p12), %s168_s30, 5760  }
  0x4b   : > { %373 = vsyncadd (%p243_p12), %s168_s30, 4294961536  ;;  %p12_p13 = scmp.ge.s32.totalorder %s435_s12, 4   ;;  %s538_s6 = smov %s380_s7 }
  0x4c   : > { %s539_s7 = smov %s384_s8  ;;  %s540_s8 = smov %s446_s15 }
  0x4d   : > { %s541_s9 = smov %s435_s12  ;;  %14 = sbr.rel (!%p12_p13) target bundleno = 4 (0x4), region = 80 }
  0x52   :  { %173 = vsyncpa [#allocation3], 1 }
  0x53   :  { %175 = vsyncpa [#allocation3 + $0x1], 1 }
  0x54   :  { %176 = vsyncpa [#allocation4], 1 }
  0x55   :  { %178 = vsyncpa [#allocation4 + $0x1], 1 }

</bundles_post_ra>
